<compile_context>
chip_gen: v7x
topology: tpu7x:2x2x1
jax: 0.10.0
libtpu: 0.0.40
codegen_flags: <defaults>
</compile_context>

<pallas_src>
import functools
import numpy as np
import jax
import jax.numpy as jnp
from jax.experimental import pallas as pl
from jax.experimental.pallas import tpu as pltpu

TM_G = 256                   # GEMM row tile
TM_E = 512                   # elementwise row tile (mem-bound roofline sweet spot)
LATENT_STRIDE = (8, 8, 4)    # matches self.latent_stride in the torch module


def _round_up(n, m):
    return ((n + m - 1) // m) * m


def _apply_act(y, act):
    if act == "relu":
        return jnp.maximum(y, 0.0)
    if act == "leaky":                       # LeakyReLU(0.1) as in the reference module
        return jnp.where(y >= 0.0, y, 0.1 * y)
    if act == "sigmoid":
        return 1.0 / (1.0 + jnp.exp(-y))
    return y


# --------------------------------------------------------------------------
# Pallas kernels
# --------------------------------------------------------------------------
def _gemm_kernel(*refs, act, has_scale, has_shift, has_mask):
    # Full contraction in one MXU pass per row tile; epilogue specialised to
    # only the fused ops this call actually needs.
    it = iter(refs)
    a_ref = next(it)
    w_ref = next(it)
    sc_ref = next(it) if has_scale else None
    sh_ref = next(it) if has_shift else None
    m_ref = next(it) if has_mask else None
    o_ref = next(it)

    y = jnp.dot(a_ref[...], w_ref[...], preferred_element_type=jnp.float32)
    if has_scale:
        y = y * sc_ref[...]
    if has_shift:
        y = y + sh_ref[...]
    y = _apply_act(y, act)
    if has_mask:
        y = y * m_ref[...]
    o_ref[...] = y


def gemm_fused(a, w, scale=None, shift=None, mask=None, act="none"):
    """out = act((a @ w) * scale + shift) * mask[:, None].

    a: (N, K)  w: (K, Cout)  scale/shift: (Cout,) or None  mask: (N,) or None.
    bf16 operands, f32 accumulation. K and Cout padded to multiples of 128
    (lane-dense stores), rows padded to the (adaptive) row tile. Weights /
    scale / shift use a constant index_map -> fetched once, VMEM-resident.
    """
    N, K = a.shape
    Cout = w.shape[-1]
    tm = min(TM_G, _round_up(N, 16))
    Np = _round_up(N, tm)
    Kp = _round_up(K, 128)
    Cp = _round_up(Cout, 128)

    a_b = a.astype(jnp.bfloat16)
    if (Np, Kp) != (N, K):
        a_b = jnp.pad(a_b, ((0, Np - N), (0, Kp - K)))
    w_b = w.astype(jnp.bfloat16)
    if (Kp, Cp) != (K, Cout):
        w_b = jnp.pad(w_b, ((0, Kp - K), (0, Cp - Cout)))

    inputs = [a_b, w_b]
    in_specs = [pl.BlockSpec((tm, Kp), lambda i: (i, 0)),
                pl.BlockSpec((Kp, Cp), lambda i: (0, 0))]     # weights resident

    has_scale = scale is not None
    has_shift = shift is not None
    has_mask = mask is not None

    if has_scale:
        sc = scale.astype(jnp.float32).reshape(1, Cout)
        if Cp != Cout:
            sc = jnp.pad(sc, ((0, 0), (0, Cp - Cout)))
        inputs.append(sc)
        in_specs.append(pl.BlockSpec((1, Cp), lambda i: (0, 0)))
    if has_shift:
        sh = shift.astype(jnp.float32).reshape(1, Cout)
        if Cp != Cout:
            sh = jnp.pad(sh, ((0, 0), (0, Cp - Cout)))
        inputs.append(sh)
        in_specs.append(pl.BlockSpec((1, Cp), lambda i: (0, 0)))
    if has_mask:
        m = mask.astype(jnp.float32).reshape(N, 1)
        if Np != N:
            m = jnp.pad(m, ((0, Np - N), (0, 0)))
        inputs.append(m)
        in_specs.append(pl.BlockSpec((tm, 1), lambda i: (i, 0)))

    out = pl.pallas_call(
        functools.partial(_gemm_kernel, act=act, has_scale=has_scale,
                          has_shift=has_shift, has_mask=has_mask),
        out_shape=jax.ShapeDtypeStruct((Np, Cp), jnp.float32),
        grid=(Np // tm,),
        in_specs=in_specs,
        out_specs=pl.BlockSpec((tm, Cp), lambda i: (i, 0)),
        compiler_params=pltpu.CompilerParams(
            dimension_semantics=("parallel",)),
    )(*inputs)
    return out[:N, :Cout]


def _ew_kernel(x_ref, sc_ref, sh_ref, m_ref, o_ref, *, act):
    y = _apply_act(x_ref[...] * sc_ref[...] + sh_ref[...], act)
    o_ref[...] = y * m_ref[...]


def _ew_res_kernel(x_ref, sc_ref, sh_ref, r_ref, rsc_ref, rsh_ref, m_ref, o_ref, *, act):
    y = (x_ref[...] * sc_ref[...] + sh_ref[...]
         + r_ref[...] * rsc_ref[...] + rsh_ref[...])
    o_ref[...] = _apply_act(y, act) * m_ref[...]


def scale_shift_act(x, scale, shift, mask, act="none"):
    """x: (N, C); scale/shift: (C,); mask: (N,). out = act(x*scale+shift)*mask."""
    N, C = x.shape
    tm = min(TM_E, _round_up(N, 8))
    Np = _round_up(N, tm)
    if Np != N:
        x = jnp.pad(x, ((0, Np - N), (0, 0)))
        mask = jnp.pad(mask, ((0, Np - N),))
    out = pl.pallas_call(
        functools.partial(_ew_kernel, act=act),
        out_shape=jax.ShapeDtypeStruct((Np, C), jnp.float32),
        grid=(Np // tm,),
        in_specs=[pl.BlockSpec((tm, C), lambda i: (i, 0)),
                  pl.BlockSpec((1, C), lambda i: (0, 0)),
                  pl.BlockSpec((1, C), lambda i: (0, 0)),
                  pl.BlockSpec((tm, 1), lambda i: (i, 0))],
        out_specs=pl.BlockSpec((tm, C), lambda i: (i, 0)),
        compiler_params=pltpu.CompilerParams(dimension_semantics=("parallel",)),
    )(x, scale.reshape(1, C), shift.reshape(1, C), mask.reshape(Np, 1))
    return out[:N]


def scale_shift_add_act(x, scale, shift, res, rscale, rshift, mask, act="relu"):
    """out = act(x*scale+shift + res*rscale+rshift) * mask — residual fuse."""
    N, C = x.shape
    tm = min(TM_E, _round_up(N, 8))
    Np = _round_up(N, tm)
    if Np != N:
        x = jnp.pad(x, ((0, Np - N), (0, 0)))
        res = jnp.pad(res, ((0, Np - N), (0, 0)))
        mask = jnp.pad(mask, ((0, Np - N),))
    out = pl.pallas_call(
        functools.partial(_ew_res_kernel, act=act),
        out_shape=jax.ShapeDtypeStruct((Np, C), jnp.float32),
        grid=(Np // tm,),
        in_specs=[pl.BlockSpec((tm, C), lambda i: (i, 0)),
                  pl.BlockSpec((1, C), lambda i: (0, 0)),
                  pl.BlockSpec((1, C), lambda i: (0, 0)),
                  pl.BlockSpec((tm, C), lambda i: (i, 0)),
                  pl.BlockSpec((1, C), lambda i: (0, 0)),
                  pl.BlockSpec((1, C), lambda i: (0, 0)),
                  pl.BlockSpec((tm, 1), lambda i: (i, 0))],
        out_specs=pl.BlockSpec((tm, C), lambda i: (i, 0)),
        compiler_params=pltpu.CompilerParams(dimension_semantics=("parallel",)),
    )(x, scale.reshape(1, C), shift.reshape(1, C),
      res, rscale.reshape(1, C), rshift.reshape(1, C), mask.reshape(Np, 1))
    return out[:N]


# --------------------------------------------------------------------------
# Minkowski-style ops built on the Pallas kernels (glue in plain JAX)
# --------------------------------------------------------------------------
def bn_scale_shift(x, mask, gamma, beta, eps=1e-5):
    # Training-mode BatchNorm1d stats over occupied rows only.
    cnt = jnp.maximum(jnp.sum(mask), 1.0)
    mean = jnp.sum(x * mask[:, None], axis=0) / cnt
    var = jnp.sum(((x - mean) ** 2) * mask[:, None], axis=0) / cnt
    inv = jax.lax.rsqrt(var + eps)
    scale = gamma * inv
    shift = beta - mean * scale
    return scale, shift


def batch_norm_act(x, mask, gamma, beta, act="none"):
    scale, shift = bn_scale_shift(x, mask, gamma, beta)
    return scale_shift_act(x, scale, shift, mask, act)


def _offsets(ks):
    r = {1: (0,), 2: (0, 1), 3: (-1, 0, 1)}[ks]
    return [(a, b, c) for a in r for b in r for c in r]


def _window(xp, off, stride, out_sp):
    # Strided static slices (no gathers) of the padded feature map.
    ox, oy, oz = off
    sx, sy, sz = stride
    Xo, Yo, Zo = out_sp
    return xp[:,
              ox + 1: ox + 1 + (Xo - 1) * sx + 1: sx,
              oy + 1: oy + 1 + (Yo - 1) * sy + 1: sy,
              oz + 1: oz + 1 + (Zo - 1) * sz + 1: sz, :]


def _maxpool_mask(mask, stride):
    B, X, Y, Z = mask.shape
    sx, sy, sz = stride
    m = mask.reshape(B, X // sx, sx, Y // sy, sy, Z // sz, sz)
    return m.max(axis=(2, 4, 6))


def mink_conv(feat, mask, w, ks=3, stride=(1, 1, 1), shift=None,
              mask_flat=None, act="none"):
    """MinkowskiConvolution via bf16 im2col with the offset axis folded into
    the GEMM contraction; bias/act/mask optionally fused in the epilogue."""
    B, X, Y, Z, Cin = feat.shape
    K, _, Cout = w.shape
    sx, sy, sz = stride
    Xo, Yo, Zo = X // sx, Y // sy, Z // sz
    xm = (feat * mask[..., None]).astype(jnp.bfloat16)   # bf16 im2col stream
    if ks == 1 and stride == (1, 1, 1):
        # 1x1x1 conv: no pad / window / concat — straight to the GEMM.
        a = xm.reshape(B * X * Y * Z, Cin)
    else:
        xp = jnp.pad(xm, ((0, 0), (1, 1), (1, 1), (1, 1), (0, 0)))
        cols = [_window(xp, off, stride, (Xo, Yo, Zo)) for off in _offsets(ks)]
        a = jnp.concatenate(cols, axis=-1).reshape(B * Xo * Yo * Zo, K * Cin)
    out = gemm_fused(a, w.reshape(K * Cin, Cout),
                     shift=shift, mask=mask_flat, act=act)
    out = out.reshape(B, Xo, Yo, Zo, Cout)
    out_mask = mask if stride == (1, 1, 1) else _maxpool_mask(mask, stride)
    return out, out_mask


def mink_gen_deconv(feat, mask, w, stride):
    """MinkowskiGenerativeConvolutionTranspose, kernel_size=2.

    Output assembly uses transpose/reshape interleaving for stride-2 axes;
    only the overlapping stride-1 z axis (the (2,2,1) deconv) keeps one
    shifted add.
    """
    B, X, Y, Z, Cin = feat.shape
    Cout = w.shape[-1]
    sx, sy, sz = stride                       # sx == sy == 2 in this network
    xflat = (feat * mask[..., None]).astype(jnp.bfloat16).reshape(-1, Cin)
    w2 = jnp.transpose(w, (1, 0, 2)).reshape(Cin, 8 * Cout)
    y = gemm_fused(xflat, w2)                 # (N, 8*Cout), single Pallas GEMM
    y = y.reshape(B, X, Y, Z, 2, 2, 2, Cout)
    y = jnp.transpose(y, (0, 1, 4, 2, 5, 3, 6, 7))      # (B, X, kx, Y, ky, Z, kz, C)
    if sz == 2:
        out = y.reshape(B, 2 * X, 2 * Y, 2 * Z, Cout)
        out_mask = jnp.broadcast_to(
            mask[:, :, None, :, None, :, None],
            (B, X, 2, Y, 2, Z, 2)).reshape(B, 2 * X, 2 * Y, 2 * Z)
    else:
        slab = y.reshape(B, 2 * X, 2 * Y, Z, 2, Cout)
        out = slab[..., 0, :]
        # TODO(synk): generative outputs falling outside the dense grid extent
        # (z == Z for the kz=1 tap) are dropped; ME's unbounded sparse coords
        # are not representable in a fixed dense grid.
        out = out.at[:, :, :, 1:, :].add(slab[:, :, :, :-1, 1, :])
        mask_up = jnp.broadcast_to(
            mask[:, :, None, :, None, :],
            (B, X, 2, Y, 2, Z)).reshape(B, 2 * X, 2 * Y, Z)
        out_mask = jnp.maximum(
            mask_up,
            jnp.pad(mask_up[:, :, :, :-1], ((0, 0), (0, 0), (0, 0), (1, 0))))
    return out, out_mask


# --------------------------------------------------------------------------
# Blocks
# --------------------------------------------------------------------------
def conv_bn_relu(feat, mask, p, ks, stride):
    f, m = mink_conv(feat, mask, p["w"], ks=ks, stride=stride)
    B, X, Y, Z, C = f.shape
    ff = batch_norm_act(f.reshape(-1, C), m.reshape(-1), p["gamma"], p["beta"], "relu")
    return ff.reshape(B, X, Y, Z, C), m


def deconv_bn_relu(feat, mask, p, stride):
    f, m = mink_gen_deconv(feat, mask, p["w"], stride)
    B, X, Y, Z, C = f.shape
    ff = batch_norm_act(f.reshape(-1, C), m.reshape(-1), p["gamma"], p["beta"], "relu")
    return ff.reshape(B, X, Y, Z, C), m


def residual_block(feat, mask, p):
    B, X, Y, Z, Cin = feat.shape
    mflat = mask.reshape(-1)
    f1, _ = mink_conv(feat, mask, p["w1"], ks=3)
    C = f1.shape[-1]
    f1 = batch_norm_act(f1.reshape(-1, C), mflat, p["g1"], p["b1"], "relu")
    f1 = f1.reshape(B, X, Y, Z, C)
    f2, _ = mink_conv(f1, mask, p["w2"], ks=3)
    f2 = f2.reshape(-1, C)
    s2, b2 = bn_scale_shift(f2, mflat, p["g2"], p["b2"])
    if "wd" in p:
        fd, _ = mink_conv(feat, mask, p["wd"], ks=1)
        fd = fd.reshape(-1, C)
        sd, bd = bn_scale_shift(fd, mflat, p["gd"], p["bd"])
    else:
        fd = feat.reshape(-1, C)
        sd = jnp.ones((C,), jnp.float32)
        bd = jnp.zeros((C,), jnp.float32)
    out = scale_shift_add_act(f2, s2, b2, fd, sd, bd, mflat, "relu")
    return out.reshape(B, X, Y, Z, C), mask


def prune_class_head(feat, mask, p):
    # Conv3x3(C->1, bias) + Sigmoid; bias/sigmoid/mask fused in the GEMM epilogue
    # (Cout padded to 128 inside the GEMM -> lane-dense stores, sliced outside).
    f, _ = mink_conv(feat, mask, p["w"], ks=3,
                     shift=p["b"], mask_flat=mask.reshape(-1), act="sigmoid")
    return f[..., 0]


def mink_linear(x, mask, p, act="none"):
    # Linear + bias + act (+ occupancy mask) in one fused Pallas GEMM.
    return gemm_fused(x, p["w"], shift=p["b"], mask=mask, act=act)


def two_layer_head(x, mask, p, final_act="none"):
    h = mink_linear(x, mask, p["l1"], "leaky")
    return mink_linear(h, mask, p["l2"], final_act)


# --------------------------------------------------------------------------
# Parameters (deterministic synthetic init)
# --------------------------------------------------------------------------
def init_params(key):
    keys = [key]

    def nk():
        keys[0], sub = jax.random.split(keys[0])
        return sub

    def conv_w(K, cin, cout):
        return jax.random.normal(nk(), (K, cin, cout), jnp.float32) / np.sqrt(K * cin)

    def bn(c):
        return {"gamma": jnp.ones((c,), jnp.float32),
                "beta": jnp.zeros((c,), jnp.float32)}

    def conv_bn(K, cin, cout):
        d = {"w": conv_w(K, cin, cout)}
        d.update(bn(cout))
        return d

    def lin(cin, cout):
        return {"w": jax.random.normal(nk(), (cin, cout), jnp.float32) / np.sqrt(cin),
                "b": 0.01 * jax.random.normal(nk(), (cout,), jnp.float32)}

    def rb(cin, cout):
        d = {"w1": conv_w(27, cin, cout), "w2": conv_w(27, cout, cout),
             "g1": jnp.ones((cout,), jnp.float32), "b1": jnp.zeros((cout,), jnp.float32),
             "g2": jnp.ones((cout,), jnp.float32), "b2": jnp.zeros((cout,), jnp.float32)}
        if cin != cout:
            d["wd"] = conv_w(1, cin, cout)
            d["gd"] = jnp.ones((cout,), jnp.float32)
            d["bd"] = jnp.zeros((cout,), jnp.float32)
        return d

    def cls_head(cin):
        return {"w": conv_w(27, cin, 1),
                "b": 0.01 * jax.random.normal(nk(), (1,), jnp.float32)}

    cs = [32, 64, 128, 128, 128, 128, 64]
    in_ch, out_ch = 3, 3
    return {
        "stem": conv_bn(27, in_ch, cs[0]),
        "s1_conv": conv_bn(8, cs[0], cs[0]),
        "s1_rb1": rb(cs[0], cs[1]), "s1_rb2": rb(cs[1], cs[1]),
        "s2_conv": conv_bn(8, cs[1], cs[1]),
        "s2_rb1": rb(cs[1], cs[3]), "s2_rb2": rb(cs[3], cs[3]),
        "hidden": {"l1": lin(cs[3], cs[2]), "l2": lin(cs[2], cs[3])},
        "mean_head": {"l1": lin(cs[3], cs[2]), "l2": lin(cs[2], cs[3])},
        "logvar_head": {"l1": lin(cs[3], cs[2]), "l2": lin(cs[2], cs[3])},
        "dense_proj": {"l1": lin(cs[3], cs[2]), "l2": lin(cs[2], cs[3])},
        "up0_cls": cls_head(cs[3]),
        "up1_deconv": conv_bn(8, cs[3], cs[4]),
        "up1_rb1": rb(cs[4], cs[4]), "up1_rb2": rb(cs[4], cs[4]),
        "up1_cls": cls_head(cs[4]),
        "up2_deconv": conv_bn(8, cs[4], cs[5]),
        "up2_rb1": rb(cs[5], cs[5]), "up2_rb2": rb(cs[5], cs[5]),
        "up2_cls": cls_head(cs[5]),
        "up3_deconv": conv_bn(8, cs[5], cs[6]),
        "up3_rb1": rb(cs[6], cs[6]), "up3_rb2": rb(cs[6], cs[6]),
        "up3_cls": cls_head(cs[6]),
        "last": {"l1": lin(cs[6], 20), "l2": lin(20, out_ch)},
    }


# --------------------------------------------------------------------------
# Full forward pass (training=True path of MinkUNet.forward)
# --------------------------------------------------------------------------
def minkunet_forward(params, feat, mask, noise_key, training=True):
    B, X, Y, Z, _ = feat.shape

    # ----- encoder -----
    x0, m0 = conv_bn_relu(feat, mask, params["stem"], ks=3, stride=(1, 1, 1))
    x1, m1 = conv_bn_relu(x0, m0, params["s1_conv"], ks=2, stride=(4, 4, 2))
    x1, m1 = residual_block(x1, m1, params["s1_rb1"])
    x1, m1 = residual_block(x1, m1, params["s1_rb2"])
    x2, m2 = conv_bn_relu(x1, m1, params["s2_conv"], ks=2, stride=(2, 2, 2))
    x2, m2 = residual_block(x2, m2, params["s2_rb1"])
    x2, m2 = residual_block(x2, m2, params["s2_rb2"])

    Bx, Lx, Ly, Lz, C = x2.shape
    # x2.dense(): unoccupied voxels are already zero in our layout; the dense
    # 1x1x1-Conv3d heads process every voxel -> no occupancy mask needed.
    dense = x2.reshape(-1, C)
    hid = two_layer_head(dense, None, params["hidden"], "none")
    mean = two_layer_head(hid, None, params["mean_head"], "none")
    logvar = two_layer_head(hid, None, params["logvar_head"], "none")
    std = jnp.exp(0.5 * logvar)
    eps = jax.random.normal(noise_key, mean.shape, jnp.float32)
    reparam = mean + std * eps

    # ----- decoder (sparse_to_dense makes every latent voxel active) -----
    dec_mask = jnp.ones((Bx, Lx, Ly, Lz), jnp.float32)
    x2_proj = two_layer_head(reparam, None, params["dense_proj"], "none")
    x2_proj = x2_proj.reshape(Bx, Lx, Ly, Lz, C)

    def prune_stage(f, m, cls_p, thr, tgt_pool):
        # TODO(synk): get_target_prune's coordinate-manager kernel_map is
        # emulated by max-pooling the input occupancy to the current stride.
        cls = prune_class_head(f, m, cls_p)
        target = _maxpool_mask(mask, tgt_pool) * m
        keep = (cls > thr).astype(jnp.float32)
        if training:
            keep = jnp.maximum(keep, target)
        keep = keep * m
        return f * keep[..., None], keep, cls, target

    x2_prune, x2_keep, x2_cls, x2_tgt = prune_stage(
        x2_proj, dec_mask, params["up0_cls"], 0.5, LATENT_STRIDE)

    y1, my1 = deconv_bn_relu(x2_prune, x2_keep, params["up1_deconv"], (2, 2, 2))
    y1, my1 = residual_block(y1, my1, params["up1_rb1"])
    y1, my1 = residual_block(y1, my1, params["up1_rb2"])
    y1_prune, y1_keep, y1_cls, y1_tgt = prune_stage(
        y1, my1, params["up1_cls"], 0.5, (4, 4, 2))

    y2, my2 = deconv_bn_relu(y1_prune, y1_keep, params["up2_deconv"], (2, 2, 1))
    y2, my2 = residual_block(y2, my2, params["up2_rb1"])
    y2, my2 = residual_block(y2, my2, params["up2_rb2"])
    y2_prune, y2_keep, y2_cls, y2_tgt = prune_stage(
        y2, my2, params["up2_cls"], 0.3, (2, 2, 2))

    y3, my3 = deconv_bn_relu(y2_prune, y2_keep, params["up3_deconv"], (2, 2, 2))
    y3, my3 = residual_block(y3, my3, params["up3_rb1"])
    y3, my3 = residual_block(y3, my3, params["up3_rb2"])
    y3_prune, y3_keep, y3_cls, y3_tgt = prune_stage(
        y3, my3, params["up3_cls"], 0.3, (1, 1, 1))

    Cy = y3_prune.shape[-1]
    y4 = two_layer_head(y3_prune.reshape(-1, Cy), y3_keep.reshape(-1),
                        params["last"], "sigmoid")
    y4 = y4.reshape(B, X, Y, Z, -1)
    y4_tgt = mask * y3_keep

    lshape = (Bx, Lx, Ly, Lz, C)
    return {
        "reparam": reparam.reshape(lshape),
        "mean": mean.reshape(lshape),
        "logvar": logvar.reshape(lshape),
        "feats": {"x2": (x2, m2), "y1": (y1, my1), "y2": (y2, my2),
                  "y3": (y3, my3), "y4": (y4, y3_keep)},
        "cls": {"x2": x2_cls, "y1": y1_cls, "y2": y2_cls, "y3": y3_cls},
        "targets": {"x2": x2_tgt, "y1": y1_tgt, "y2": y2_tgt,
                    "y3": y3_tgt, "y4": y4_tgt},
    }


# --------------------------------------------------------------------------
if __name__ == "__main__":
    key = jax.random.PRNGKey(0)
    kp, kf, km, kn = jax.random.split(key, 4)

    # Small input grid: X, Y multiples of 8 and Z multiple of 4 so the total
    # encoder stride (8, 8, 4) == latent_stride holds exactly.
    B, X, Y, Z, Cin = 1, 16, 16, 8, 3
    params = init_params(kp)
    occ = (jax.random.uniform(km, (B, X, Y, Z)) > 0.5).astype(jnp.float32)
    feat = jax.random.normal(kf, (B, X, Y, Z, Cin), jnp.float32) * occ[..., None]

    out = minkunet_forward(params, feat, occ, kn, training=True)
    jax.block_until_ready(out)

    y4, y4_mask = out["feats"]["y4"]
    assert y4.shape == (B, X, Y, Z, 3)
    assert out["reparam"].shape == (B, X // 8, Y // 8, Z // 4, 128)
    assert bool(jnp.all(jnp.isfinite(y4)))
    print("KERNEL_OK")
</pallas_src>

<mosaic_0001>
module attributes {stable_mosaic.version = 11 : i64} {
  func.func @_gemm_kernel(%arg0: i32, %arg1: memref<256x128xbf16, #tpu.memory_space<vmem>>, %arg2: memref<128x128xbf16, #tpu.memory_space<vmem>>, %arg3: memref<256x128xf32, #tpu.memory_space<vmem>>) attributes {dimension_semantics = [#tpu.dimension_semantics<parallel>], iteration_bounds = array<i64: 8>, scalar_prefetch = 0 : i64, scratch_operands = 0 : i64, tpu.core_type = #tpu.core_type<tc>, window_params = [{transform_indices = @transform_0, window_bounds = array<i64: 256, 128>}, {pipeline_mode = #tpu.pipeline_mode<synchronous>, transform_indices = @transform_1, window_bounds = array<i64: 128, 128>}, {transform_indices = @transform_2, window_bounds = array<i64: 256, 128>}]} {
    %c0 = arith.constant 0 : index
    %c0_0 = arith.constant 0 : index
    %0 = vector.load %arg1[%c0, %c0_0] : memref<256x128xbf16, #tpu.memory_space<vmem>>, vector<256x128xbf16>
    %c0_1 = arith.constant 0 : index
    %c0_2 = arith.constant 0 : index
    %1 = vector.load %arg2[%c0_1, %c0_2] : memref<128x128xbf16, #tpu.memory_space<vmem>>, vector<128x128xbf16>
    %cst = arith.constant dense<0.000000e+00> : vector<256x128xf32>
    %2 = tpu.matmul %0, %1, %cst {dimension_numbers = #tpu.dot_dimension_numbers<[1], [0], [0], [1], [0, 0, 1, 1], [], []>} : vector<256x128xbf16>, vector<128x128xbf16>, vector<256x128xf32> -> vector<256x128xf32>
    %c0_3 = arith.constant 0 : index
    %c0_4 = arith.constant 0 : index
    %3 = vector.load %arg3[%c0_3, %c0_4] : memref<256x128xf32, #tpu.memory_space<vmem>>, vector<256x128xf32>
    tpu.vector_store %arg3[%c0_3, %c0_4], %2 {strides = array<i32>} : memref<256x128xf32, #tpu.memory_space<vmem>>, vector<256x128xf32>,
    return
  }
  func.func @transform_0(%arg0: i32) -> (i32, i32) {
    %c0_i32 = arith.constant 0 : i32
    %c0_i32_0 = arith.constant 0 : i32
    return %arg0, %c0_i32 : i32, i32
  }
  func.func @transform_1(%arg0: i32) -> (i32, i32) {
    %c0_i32 = arith.constant 0 : i32
    %c0_i32_0 = arith.constant 0 : i32
    %c0_i32_1 = arith.constant 0 : i32
    return %c0_i32, %c0_i32_0 : i32, i32
  }
  func.func @transform_2(%arg0: i32) -> (i32, i32) {
    %c0_i32 = arith.constant 0 : i32
    %c0_i32_0 = arith.constant 0 : i32
    return %arg0, %c0_i32 : i32, i32
  }
}

</mosaic_0001>

<bundles_post_ra>
// kernel: tpu_custom_call.1
= control target key start
LH: loop header
LB: loop body
LE: loop exit
PB: predicated region body
PF: predicated region fallthrough
CT: control target
= control target key end

     0   :  { %7 = vsyncpa [#allocation3], 0  ;;  %s1281_s0 = inlined_call_operand.hbm [shape: bf16[2048,128], index: 0, kind: input, shape index: {}]   ;;  %s1282_s1 = inlined_call_operand.hbm [shape: bf16[128,128], index: 1, kind: input, shape index: {}]   ;;  %s1283_s2 = inlined_call_operand.hbm [shape: f32[2048,128], index: 2, kind: output, shape index: {}]  }
   0x1   :  { %9 = vsyncpa [#allocation3 + $0x1], 0 }
   0x2   :  { %10 = vsyncpa [#allocation6], 0 }
   0x3   :  { %11 = vsyncpa [#allocation4], 0 }
   0x4   :  { %13 = vsyncpa [#allocation4 + $0x1], 0  ;;  %s1029_s9 = smov 0   ;;  %s1031_s10 = smov 0  }
   0x5   :  { %s1033_s11 = smov 0   ;;  %s1035_s12 = smov 0  }
   0x6 LB: > { %s1050_s13 = sadd.s32 4294967295, %s1005_s12   ;;  %s662_s14 = sadd.s32 4294967294, %s1005_s12   ;;  %s1005_s12 = sphi %s1035_s12, %s1302_s12   ;;  %s1001_s11 = sphi %s1033_s11, %s1301_s11   ;;  %s997_s10 = sphi %s1031_s10, %s1300_s10   ;;  %s993_s9 = sphi %s1029_s9, %s1299_s9  }
   0x7   : > { %p39_p0 = scmp.ne.s32.totalorder %s997_s10, %s993_s9  ;;  %p1284_p1 = scmp.eq.s32.totalorder %s1050_s13, 0 }
   0x8   : > { %p90_p3 = scmp.eq.s32.totalorder %s662_s14, 7  ;;  %p663_p5 = scmp.ge.s32.totalorder %s1005_s12, 1 }
   0x9   : > { %p1059_p4 = por %p1284_p1, %p39_p0  ;;  %p97_p7 = scmp.lt.s32.totalorder %s1005_s12, 9 }
   0xa   : > { %p1064_p6 = por %p90_p3, %p39_p0  ;;  %s1007_s18 = smov [#allocation5]  }
   0xb   : > { %s1287_s15 = scalar_select %p1059_p4, 1, 0 }
   0xc   : > { %s1288_s16 = scalar_select %p1064_p6, 1, 0 }
   0xd   : > { %p1069_p8 = pnand %p663_p5, %p97_p7  ;;  %s109_s19 = sshll.u32 %s1007_s18, 4  ;;  %s110_s19 = int_to_ptr.vmem [resolvable:$true] %s109_s19 }
   0xe   : > { %s1082_s21 = sadd.s32 1, %s1005_s12   ;;  %s26_s22 = sadd.s32 1, %s1001_s11 }
   0xf   : > { %s1289_s17 = scalar_select %p1069_p8, 1, 0 }
  0x10   : > { %p800_p9 = pneg %p1069_p8  ;;  %s23_s23 = ssub.s32 %s1005_s12, %s1082_s21 }
  0x11   : > { %s877_s26 = scalar_lea.hbm %s1282_s1, 1024 }
  0x12   : > { %p1077_p10 = pnand %p800_p9, %p1284_p1  ;;  %p878_p11 = scmp.ne.s32.totalorder %s1282_s1, %s877_s26 }
  0x13   : > { %p884_p3 = scmp.lt.u32.totalorder %s877_s26, %s1282_s1 }
  0x14   : > { %p879_p12 = pneg %p1077_p10 }
  0x16   : > { %p880_p13 = pnand %p879_p12, %p878_p11 }
  0x18   : > { %p881_p0 = pneg %p880_p13 }
  0x1a   : > { %p886_p5 = pnand %p884_p3, %p881_p0 }
  0x1c   : > { %889 = shalt.err (!%p886_p5)
}
  0x1d   : > { %s890_s3 = scalar_lea.vmem %s110_s19, 1024  ;;  %p898_p2 = scmp.lt.s32.totalorder %s110_s19, %s110_s19 }
  0x1e   : > { %p891_p7 = scmp.ne.s32.totalorder %s110_s19, %s890_s3  ;;  %p899_p6 = scmp.lt.s32.totalorder %s890_s3, %s890_s3 }
  0x20   : > { %p893_p9 = pnand %p891_p7, %p879_p12  ;;  %p900_p4 = por %p899_p6, %p898_p2 }
  0x22   : > { %p894_p1 = pneg %p893_p9 }
  0x24   : > { %p901_p8 = pnand %p900_p4, %p894_p1 }
  0x26   : > { %904 = shalt.err (!%p901_p8)
}
  0x27   : > { %s1008_s4 = smov 64   ;;  %s1009_s5 = smov 4  }
  0x28   : > { %803 = dma.hbm_to_vmem [thread:$0]  (!%p1077_p10), %s1282_s1, 1024, %s110_s19, [#allocation6], %s1008_s4, %s1008_s4, %s1009_s5  }
  0x29   : > { %p24_p1 = scmp.eq.s32.totalorder %s23_s23, 0  ;;  %p33_p2 = scmp.ne.s32.totalorder %s1001_s11, %s997_s10 }
  0x2a   : > { %p34_p4 = scmp.eq.s32.totalorder %s1005_s12, 0  ;;  %p813_p6 = scmp.lt.s32.totalorder %s1005_s12, 8 }
  0x2b   : > { %s1111_s8 = scalar_select %p24_p1, %s1001_s11, %s26_s22  }
  0x2c   : > { %p35_p8 = por %p34_p4, %p33_p2  ;;  %p1291_p11 = scmp.eq.s32.totalorder %s1050_s13, 7 }
  0x2d   : > { %s123_s18 = sand.u32 1, %s1001_s11   ;;  %s702_s20 = sshll.u32 %s1005_s12, 11 }
  0x2e   : > { %p1115_p12 = por %p1291_p11, %p33_p2  ;;  %s666_s24 = sshll.u32 %s123_s18, 7 }
  0x2f   : > { %s1124_s27 = scalar_lea.hbm %s1281_s0, %s702_s20  ;;  %s127_s19 = scalar_lea.vmem [#allocation2], %s666_s24 }
  0x30   : > { %s134_s22 = sshll.u32 %s127_s19, 4  ;;  %p1126_p10 = pnand %p813_p6, %p35_p8  ;;  %s1130_s22 = int_to_ptr.vmem [resolvable:$true] %s134_s22 }
  0x31   : > { %s1132_s28 = scalar_lea.sflag [#allocation3], %s123_s18  ;;  %s905_s29 = scalar_lea.hbm %s1124_s27, 2048 }
  0x32   : > { %p906_p13 = scmp.ne.s32.totalorder %s1124_s27, %s905_s29  ;;  %p907_p0 = pneg %p1126_p10 }
  0x33   : > { %s910_s6 = scalar_lea.hbm %s1281_s0, 16384  ;;  %p911_p7 = scmp.lt.u32.totalorder %s1124_s27, %s1281_s0 }
  0x34   : > { %p908_p3 = pnand %p907_p0, %p906_p13  ;;  %p912_p9 = scmp.lt.u32.totalorder %s910_s6, %s905_s29 }
  0x35   : > { %p914_p2 = scmp.lt.u32.totalorder %s905_s29, %s1124_s27 }
  0x36   : > { %p909_p5 = pneg %p908_p3  ;;  %p913_p1 = por %p912_p9, %p911_p7 }
  0x38   : > { %p915_p4 = por %p914_p2, %p913_p1 }
  0x3a   : > { %p916_p6 = pnand %p915_p4, %p909_p5 }
  0x3c   : > { %919 = shalt.err (!%p916_p6)
}
  0x3d   : > { %s920_s18 = scalar_lea.vmem %s1130_s22, 2048  ;;  %s1010_s24 = smov [#allocation2]  }
  0x3e   : > { %p921_p8 = scmp.ne.s32.totalorder %s1130_s22, %s920_s18  ;;  %s925_s25 = sshll.u32 %s1010_s24, 4  ;;  %s926_s25 = int_to_ptr.vmem [resolvable:$false] %s925_s25 }
  0x3f   : > { %s927_s26 = scalar_lea.vmem %s926_s25, 4096  ;;  %p928_p3 = scmp.lt.s32.totalorder %s1130_s22, %s926_s25 }
  0x40   : > { %p923_p11 = pnand %p921_p8, %p907_p0  ;;  %p929_p7 = scmp.lt.s32.totalorder %s927_s26, %s920_s18 }
  0x42   : > { %p924_p13 = pneg %p923_p11  ;;  %p930_p9 = por %p929_p7, %p928_p3 }
  0x44   : > { %p931_p1 = pnand %p930_p9, %p924_p13 }
  0x46   : > { %934 = shalt.err (!%p931_p1)
}
  0x47   : > { %807 = dma.hbm_to_vmem [thread:$0]  (!%p1126_p10), %s1124_s27, 2048, %s1130_s22, %s1132_s28, %s1008_s4, %s1008_s4, %s1009_s5  }
  0x48   : > { %p1294_p0 = scmp.ne.s32.totalorder %s1289_s17, 0 }
  0x49   : > { %s1166_s19 = sand.u32 (!%p1294_p0), 1, %s997_s10   ;;  %p1295_p5 = scmp.ne.s32.totalorder (!%p1294_p0), %s1287_s15, 0 }
  0x4a   : > { %146 = sbr.rel (%p1294_p0) target bundleno = 372 (0x174), region = 28  ;;  %s670_s29 = sshll.u32 (!%p1294_p0), %s1166_s19, 7 }
  0x4b   : > { %s149_s30 = scalar_lea.sflag (!%p1294_p0), [#allocation3], %s1166_s19  ;;  %s1170_s3 = scalar_lea.vmem (!%p1294_p0), [#allocation2], %s670_s29 }
  0x51   : > { %980 = dma.done.wait (%p1295_p5), %s149_s30, 2048  }
  0x52   : > { %982 = vsyncadd (%p1295_p5), %s149_s30, 4294965248  ;;  %p1296_p10 = scmp.eq.s32.totalorder %s1050_s13, 0 }
  0x54   : > { %984 = dma.done.wait (%p1296_p10), [#allocation6], 1024   ;;  %p1297_p2 = pmov %p1296_p10 }
  0x55   : > { %v853_v0 = vld [vmem:[#allocation5] sm:$0xff]   ;;  %v854_v1 = vld [vmem:[#allocation5 + $0x8] sm:$0xff]   ;;  %v855_v2 = vld [vmem:[#allocation5 + $0x10] sm:$0xff]   ;;  %s672_s15 = sshll.u32 %s1166_s19, 8  ;;  %s703_s4 = sshll.u32 %s1050_s13, 12 }
  0x56   : > { %986 = vsyncadd (%p1297_p2), [#allocation6], 4294966272  ;;  %728 = vmatprep.subr.bf16.mxu0 %v853_v0  ;;  %776 = vmatprep.subr.bf16.mxu1 %v853_v0  ;;  %v856_v3 = vld [vmem:[#allocation5 + $0x18] sm:$0xff]   ;;  %v861_v4 = vld [vmem:[%s1170_s3] sm:$0xff]   ;;  %s1197_s17 = scalar_lea.vmem [#allocation7], %s672_s15  ;;  %s1230_s23 = scalar_lea.hbm %s1283_s2, %s703_s4 }
  0x57   : > { %729 = vmatpush3.bf16.msra.mxu0 %v853_v0  ;;  %784 = vmatpush3.bf16.msra.mxu1 %v853_v0  ;;  %v862_v5 = vld [vmem:[%s1170_s3 + $0x40] sm:$0xff]   ;;  %v858_v7 = vld [vmem:[#allocation5 + $0x28] sm:$0xff]   ;;  %v859_v8 = vld [vmem:[#allocation5 + $0x30] sm:$0xff]   ;;  %s579_s5 = sshll.u32 %s1197_s17, 4  ;;  %s566_s13 = scalar_lea.sflag [#allocation4], %s1166_s19  ;;  %s1232_s5 = int_to_ptr.vmem [resolvable:$true] %s579_s5 }
  0x58   : > { %730 = vmatprep.subr.bf16.mxu0 %v854_v1  ;;  %777 = vmatprep.subr.bf16.mxu1 %v854_v1  ;;  %v857_v6 = vld [vmem:[#allocation5 + $0x20] sm:$0xff]   ;;  %v860_v9 = vld [vmem:[#allocation5 + $0x38] sm:$0xff]   ;;  %v863_v10 = vld [vmem:[%s1170_s3 + $0x8] sm:$0xff]   ;;  %s935_s28 = scalar_lea.vmem %s1232_s5, 4096  ;;  %s1011_s6 = smov [#allocation7]  }
  0x59   : > { %744 = vmatprep.mubr.bf16.mxu0 %v861_v4  ;;  %760 = vmatprep.mubr.bf16.mxu1 %v862_v5  ;;  %v864_v11 = vld [vmem:[%s1170_s3 + $0x48] sm:$0xff]   ;;  %v865_v12 = vld [vmem:[%s1170_s3 + $0x10] sm:$0xff]   ;;  %v867_v14 = vld [vmem:[%s1170_s3 + $0x18] sm:$0xff]   ;;  %p936_p4 = scmp.ne.s32.totalorder %s1232_s5, %s935_s28  ;;  %s939_s7 = sshll.u32 %s1011_s6, 4  ;;  %s940_s7 = int_to_ptr.vmem [resolvable:$false] %s939_s7 }
  0x5a   : > { %v866_v13 = vld [vmem:[%s1170_s3 + $0x50] sm:$0xff]   ;;  %v868_v15 = vld [vmem:[%s1170_s3 + $0x58] sm:$0xff]   ;;  %v869_v16 = vld [vmem:[%s1170_s3 + $0x20] sm:$0xff]   ;;  %s941_s20 = scalar_lea.vmem %s940_s7, 8192  ;;  %p942_p11 = scmp.lt.s32.totalorder %s1232_s5, %s940_s7 }
  0x5b   : > { %731 = vmatpush3.bf16.msra.mxu0 %v854_v1  ;;  %785 = vmatpush3.bf16.msra.mxu1 %v854_v1  ;;  %v870_v17 = vld [vmem:[%s1170_s3 + $0x60] sm:$0xff]   ;;  %v871_v18 = vld [vmem:[%s1170_s3 + $0x28] sm:$0xff]   ;;  %v873_v20 = vld [vmem:[%s1170_s3 + $0x30] sm:$0xff]   ;;  %p937_p6 = pnand %p936_p4, %p1115_p12  ;;  %p943_p13 = scmp.lt.s32.totalorder %s941_s20, %s935_s28 }
  0x5c   : > { %732 = vmatprep.subr.bf16.mxu0 %v855_v2  ;;  %778 = vmatprep.subr.bf16.mxu1 %v855_v2  ;;  %v872_v19 = vld [vmem:[%s1170_s3 + $0x68] sm:$0xff]   ;;  %v874_v21 = vld [vmem:[%s1170_s3 + $0x70] sm:$0xff]   ;;  %v875_v22 = vld [vmem:[%s1170_s3 + $0x38] sm:$0xff]  }
  0x5d   : > { %v876_v23 = vld [vmem:[%s1170_s3 + $0x78] sm:$0xff]   ;;  %p938_p8 = pneg %p937_p6  ;;  %p944_p3 = por %p943_p13, %p942_p11 }
  0x5f   : > { %733 = vmatpush3.bf16.msra.mxu0 %v855_v2  ;;  %786 = vmatpush3.bf16.msra.mxu1 %v855_v2  ;;  %p945_p7 = pnand %p944_p3, %p938_p8 }
  0x60   : > { %734 = vmatprep.subr.bf16.mxu0 %v856_v3  ;;  %779 = vmatprep.subr.bf16.mxu1 %v856_v3 }
  0x63   : > { %735 = vmatpush3.bf16.msra.mxu0 %v856_v3  ;;  %787 = vmatpush3.bf16.msra.mxu1 %v856_v3 }
  0x64   : > { %736 = vmatprep.subr.bf16.mxu0 %v857_v6  ;;  %780 = vmatprep.subr.bf16.mxu1 %v857_v6 }
  0x67   : > { %737 = vmatpush3.bf16.msra.mxu0 %v857_v6  ;;  %788 = vmatpush3.bf16.msra.mxu1 %v857_v6 }
  0x68   : > { %738 = vmatprep.subr.bf16.mxu0 %v858_v7  ;;  %781 = vmatprep.subr.bf16.mxu1 %v858_v7 }
  0x6b   : > { %739 = vmatpush3.bf16.msra.mxu0 %v858_v7  ;;  %789 = vmatpush3.bf16.msra.mxu1 %v858_v7 }
  0x6c   : > { %740 = vmatprep.subr.bf16.mxu0 %v859_v8  ;;  %782 = vmatprep.subr.bf16.mxu1 %v859_v8 }
  0x6f   : > { %741 = vmatpush3.bf16.msra.mxu0 %v859_v8  ;;  %790 = vmatpush3.bf16.msra.mxu1 %v859_v8 }
  0x70   : > { %742 = vmatprep.subr.bf16.mxu0 %v860_v9  ;;  %783 = vmatprep.subr.bf16.mxu1 %v860_v9 }
  0x73   : > { %743 = vmatpush3.bf16.msra.mxu0 %v860_v9  ;;  %791 = vmatpush3.bf16.msra.mxu1 %v860_v9 }
  0x76   : > { %745 = vmatmul.mubr.bf16.vlgmr.msra.gmra.mrb[0].mxu0 %v863_v10  ;;  %761 = vmatmul.mubr.bf16.vlgmr.msra.gmra.mrb[0].mxu1 %v864_v11 }
  0x77   : > { %748 = vmatprep.mubr.bf16.mxu0 %v865_v12  ;;  %764 = vmatprep.mubr.bf16.mxu1 %v866_v13 }
  0x7e   : > { %749 = vmatmul.mubr.bf16.gmra.mrb[4].mxu0 %v867_v14  ;;  %765 = vmatmul.mubr.bf16.gmra.mrb[4].mxu1 %v868_v15 }
  0x7f   : > { %752 = vmatprep.mubr.bf16.mxu0 %v869_v16  ;;  %768 = vmatprep.mubr.bf16.mxu1 %v870_v17 }
  0x86   : > { %753 = vmatmul.mubr.bf16.gmra.mrb[8].mxu0 %v871_v18  ;;  %769 = vmatmul.mubr.bf16.gmra.mrb[8].mxu1 %v872_v19 }
  0x87   : > { %756 = vmatprep.mubr.bf16.mxu0 %v873_v20  ;;  %772 = vmatprep.mubr.bf16.mxu1 %v874_v21 }
  0x8e   : > { %757 = vmatmul.mubr.bf16.gmra.mrb[12].mxu0 %v875_v22  ;;  %773 = vmatmul.mubr.bf16.gmra.mrb[12].mxu1 %v876_v23 }
 0x149   : > { %v746_v24 = vpop.f32.mrb[0].mxu0  ;;  %v762_v25 = vpop.f32.mrb[0].mxu1 }
 0x14a   : > { %535 = vst [vmem:[%s1197_s17 + $0x10] sm:$0xff] %v746_v24  ;;  %551 = vst [vmem:[%s1197_s17 + $0x90] sm:$0xff] %v762_v25  ;;  %v406_v26 = vpop.f32.mrb[1].mxu0  ;;  %v470_v27 = vpop.f32.mrb[1].mxu1 }
 0x14b   : > { %533 = vst [vmem:[%s1197_s17] sm:$0xff] %v406_v26  ;;  %549 = vst [vmem:[%s1197_s17 + $0x80] sm:$0xff] %v470_v27  ;;  %v747_v28 = vpop.f32.mrb[2].mxu0  ;;  %v763_v29 = vpop.f32.mrb[2].mxu1 }
 0x14c   : > { %536 = vst [vmem:[%s1197_s17 + $0x18] sm:$0xff] %v747_v28  ;;  %552 = vst [vmem:[%s1197_s17 + $0x98] sm:$0xff] %v763_v29  ;;  %v409_v30 = vpop.f32.mrb[3].mxu0  ;;  %v473_v31 = vpop.f32.mrb[3].mxu1 }
 0x14d   : > { %534 = vst [vmem:[%s1197_s17 + $0x8] sm:$0xff] %v409_v30  ;;  %550 = vst [vmem:[%s1197_s17 + $0x88] sm:$0xff] %v473_v31 }
 0x151   : > { %v750_v32 = vpop.f32.mrb[4].mxu0  ;;  %v766_v33 = vpop.f32.mrb[4].mxu1 }
 0x152   : > { %539 = vst [vmem:[%s1197_s17 + $0x30] sm:$0xff] %v750_v32  ;;  %555 = vst [vmem:[%s1197_s17 + $0xb0] sm:$0xff] %v766_v33  ;;  %v422_v34 = vpop.f32.mrb[5].mxu0  ;;  %v486_v35 = vpop.f32.mrb[5].mxu1 }
 0x153   : > { %537 = vst [vmem:[%s1197_s17 + $0x20] sm:$0xff] %v422_v34  ;;  %553 = vst [vmem:[%s1197_s17 + $0xa0] sm:$0xff] %v486_v35  ;;  %v751_v36 = vpop.f32.mrb[6].mxu0  ;;  %v767_v37 = vpop.f32.mrb[6].mxu1 }
 0x154   : > { %540 = vst [vmem:[%s1197_s17 + $0x38] sm:$0xff] %v751_v36  ;;  %556 = vst [vmem:[%s1197_s17 + $0xb8] sm:$0xff] %v767_v37  ;;  %v425_v38 = vpop.f32.mrb[7].mxu0  ;;  %v489_v39 = vpop.f32.mrb[7].mxu1 }
 0x155   : > { %538 = vst [vmem:[%s1197_s17 + $0x28] sm:$0xff] %v425_v38  ;;  %554 = vst [vmem:[%s1197_s17 + $0xa8] sm:$0xff] %v489_v39 }
 0x159   : > { %v754_v40 = vpop.f32.mrb[8].mxu0  ;;  %v770_v41 = vpop.f32.mrb[8].mxu1 }
 0x15a   : > { %543 = vst [vmem:[%s1197_s17 + $0x50] sm:$0xff] %v754_v40  ;;  %559 = vst [vmem:[%s1197_s17 + $0xd0] sm:$0xff] %v770_v41  ;;  %v438_v42 = vpop.f32.mrb[9].mxu0  ;;  %v502_v43 = vpop.f32.mrb[9].mxu1 }
 0x15b   : > { %541 = vst [vmem:[%s1197_s17 + $0x40] sm:$0xff] %v438_v42  ;;  %557 = vst [vmem:[%s1197_s17 + $0xc0] sm:$0xff] %v502_v43  ;;  %v755_v44 = vpop.f32.mrb[10].mxu0  ;;  %v771_v45 = vpop.f32.mrb[10].mxu1 }
 0x15c   : > { %544 = vst [vmem:[%s1197_s17 + $0x58] sm:$0xff] %v755_v44  ;;  %560 = vst [vmem:[%s1197_s17 + $0xd8] sm:$0xff] %v771_v45  ;;  %v441_v46 = vpop.f32.mrb[11].mxu0  ;;  %v505_v47 = vpop.f32.mrb[11].mxu1 }
 0x15d   : > { %542 = vst [vmem:[%s1197_s17 + $0x48] sm:$0xff] %v441_v46  ;;  %558 = vst [vmem:[%s1197_s17 + $0xc8] sm:$0xff] %v505_v47 }
 0x161   : > { %v758_v48 = vpop.f32.mrb[12].mxu0  ;;  %v774_v49 = vpop.f32.mrb[12].mxu1 }
 0x162   : > { %547 = vst [vmem:[%s1197_s17 + $0x70] sm:$0xff] %v758_v48  ;;  %563 = vst [vmem:[%s1197_s17 + $0xf0] sm:$0xff] %v774_v49  ;;  %v454_v50 = vpop.f32.mrb[13].mxu0  ;;  %v518_v51 = vpop.f32.mrb[13].mxu1 }
 0x163   : > { %545 = vst [vmem:[%s1197_s17 + $0x60] sm:$0xff] %v454_v50  ;;  %561 = vst [vmem:[%s1197_s17 + $0xe0] sm:$0xff] %v518_v51  ;;  %v759_v52 = vpop.f32.mrb[14].mxu0  ;;  %v775_v53 = vpop.f32.mrb[14].mxu1 }
 0x164   : > { %548 = vst [vmem:[%s1197_s17 + $0x78] sm:$0xff] %v759_v52  ;;  %564 = vst [vmem:[%s1197_s17 + $0xf8] sm:$0xff] %v775_v53  ;;  %v457_v54 = vpop.f32.mrb[15].mxu0  ;;  %v521_v55 = vpop.f32.mrb[15].mxu1 }
 0x165   : > { %546 = vst [vmem:[%s1197_s17 + $0x68] sm:$0xff] %v457_v54  ;;  %562 = vst [vmem:[%s1197_s17 + $0xe8] sm:$0xff] %v521_v55 }
 0x166   : > { %948 = shalt.err (!%p945_p7)
}
 0x167   : > { %s949_s18 = scalar_lea.hbm %s1230_s23, 4096  ;;  %s953_s26 = scalar_lea.hbm %s1283_s2, 32768 }
 0x168   : > { %p950_p9 = scmp.ne.s32.totalorder %s1230_s23, %s949_s18  ;;  %p954_p5 = scmp.lt.u32.totalorder %s1230_s23, %s1283_s2 }
 0x169   : > { %p955_p10 = scmp.lt.u32.totalorder %s953_s26, %s949_s18  ;;  %p957_p4 = scmp.lt.u32.totalorder %s949_s18, %s1230_s23 }
 0x16a   : > { %p951_p1 = pnand %p950_p9, %p1115_p12 }
 0x16b   : > { %p956_p2 = por %p955_p10, %p954_p5 }
 0x16c   : > { %p952_p0 = pneg %p951_p1 }
 0x16d   : > { %p958_p6 = por %p957_p4, %p956_p2 }
 0x16f   : > { %p959_p8 = pnand %p958_p6, %p952_p0 }
 0x171   : > { %962 = shalt.err (!%p959_p8)
}
 0x172   : > { %s1012_s3 = smov 128   ;;  %s1013_s15 = smov 8  }
 0x173   : > { %798 = dma.vmem_to_hbm [thread:$0]  (%p1115_p12), %s1232_s5, 4096, %s1230_s23, %s566_s13, %s1012_s3, %s1012_s3, %s1013_s15  }
 0x174 PF: > { %p815_p11 = scmp.ge.s32.totalorder %s1005_s12, 2  ;;  %s594_s17 = sand.u32 1, %s993_s9  }
 0x175   : > { %p1298_p13 = scmp.ne.s32.totalorder %s1288_s16, 0  ;;  %s595_s4 = scalar_lea.sflag [#allocation4], %s594_s17 }
 0x177   : > { %p809_p3 = pnand %p815_p11, %p1298_p13 }
 0x179   : > { %988 = dma.done.wait (!%p809_p3), %s595_s4, 4096  }
 0x17a   : > { %990 = vsyncadd (!%p809_p3), %s595_s4, 4294963200  ;;  %p16_p7 = scmp.ge.s32.totalorder %s1082_s21, 10   ;;  %s1299_s9 = smov %s997_s10 }
 0x17b   : > { %s1300_s10 = smov %s1001_s11  ;;  %s1301_s11 = smov %s1111_s8 }
 0x17c   : > { %s1302_s12 = smov %s1082_s21  ;;  %18 = sbr.rel (!%p16_p7) target bundleno = 6 (0x6), region = 77 }
 0x183   :  { %600 = vsyncpa [#allocation3], 1 }
 0x184   :  { %602 = vsyncpa [#allocation3 + $0x1], 1 }
 0x185   :  { %603 = vsyncpa [#allocation6], 1 }
 0x186   :  { %604 = vsyncpa [#allocation4], 1 }
 0x187   :  { %606 = vsyncpa [#allocation4 + $0x1], 1 }

</bundles_post_ra>
